<compile_context>
chip_gen: v6e
topology: v6e:2x2x1
jax: 0.10.0
libtpu: 0.0.40
codegen_flags: <defaults>
</compile_context>

<pallas_src>
import jax
import jax.numpy as jnp
from jax.experimental import pallas as pl
from jax.experimental.pallas import tpu as pltpu


def _round_up(x, m):
    return ((x + m - 1) // m) * m


def _cdiv(a, b):
    return -(-a // b)


def mlp_kernel(x_ref, w1_ref, b1_ref, w2_ref, b2_ref, o_ref):
    # fc1: (tn, D) bf16 @ (D, Hp) bf16 -> f32 accumulation on the MXU.
    h = jnp.dot(x_ref[...], w1_ref[...], preferred_element_type=jnp.float32)
    # Bias + ReLU on the f32 accumulator (VPU).
    h = jnp.maximum(h + b1_ref[...], 0.0)
    # Single downcast right before fc2 to get the bf16 MXU rate.
    out = jnp.dot(h.astype(jnp.bfloat16), w2_ref[...],
                  preferred_element_type=jnp.float32)
    o_ref[...] = (out + b2_ref[...]).astype(o_ref.dtype)


def prepare_params(w1, b1, w2, b2):
    """Pad H/C to lane-dense multiples of 128 and cast weights to bf16 ONCE.

    Returns a dict reused across every classification_forward call, so the
    padding passes are hoisted out of the per-call path (zero padding is exact
    for matmul + bias + ReLU; padded output columns are sliced off later).
    """
    d, h = w1.shape
    c = w2.shape[1]
    hp = _round_up(h, 128)
    cp = _round_up(c, 128)
    w1p = jnp.zeros((d, hp), jnp.bfloat16).at[:, :h].set(w1.astype(jnp.bfloat16))
    b1p = jnp.zeros((1, hp), jnp.float32).at[0, :h].set(
        jnp.reshape(b1, (-1,)).astype(jnp.float32))
    w2p = jnp.zeros((hp, cp), jnp.bfloat16).at[:h, :c].set(w2.astype(jnp.bfloat16))
    b2p = jnp.zeros((1, cp), jnp.float32).at[0, :c].set(
        jnp.reshape(b2, (-1,)).astype(jnp.float32))
    return {"w1": w1p, "b1": b1p, "w2": w2p, "b2": b2p,
            "d": d, "h": h, "c": c, "hp": hp, "cp": cp}


def classification_forward(x, params, *, block_n=1024):
    """relu(x @ w1 + b1) @ w2 + b2  (PyTorch Classification.forward)."""
    n, d = x.shape
    assert d == params["d"], "feature dim mismatch with prepared params"
    hp, cp, c = params["hp"], params["cp"], params["c"]
    w1p, b1p, w2p, b2p = params["w1"], params["b1"], params["w2"], params["b2"]

    # Tail-aware batch tile: split n as evenly as possible into >= 2 grid steps
    # (so the "parallel" axis can span both v7x TensorCores), rounded up to 8
    # sublanes, and capped at block_n rows.
    steps = max(2, _cdiv(n, block_n))
    tn = min(_round_up(_cdiv(n, steps), 8), _round_up(n, 8))
    np_ = _round_up(n, tn)
    grid = (np_ // tn,)

    # bf16 activations; only the batch (sublane) axis is padded -- the feature
    # dim D stays at its real size (full-array last dim is a legal block dim).
    xb = x.astype(jnp.bfloat16)
    if np_ != n:
        xb = jnp.pad(xb, ((0, np_ - n), (0, 0)))

    def _call(resident_mode):
        res_kw = {} if resident_mode is None else {"pipeline_mode": resident_mode}
        return pl.pallas_call(
            mlp_kernel,
            out_shape=jax.ShapeDtypeStruct((np_, cp), jnp.float32),
            grid_spec=pl.GridSpec(
                grid=grid,
                in_specs=[
                    pl.BlockSpec((tn, d), lambda i: (i, 0)),            # x marches over batch
                    pl.BlockSpec((d, hp), lambda i: (0, 0), **res_kw),  # weights stay VMEM-resident
                    pl.BlockSpec((1, hp), lambda i: (0, 0), **res_kw),
                    pl.BlockSpec((hp, cp), lambda i: (0, 0), **res_kw),
                    pl.BlockSpec((1, cp), lambda i: (0, 0), **res_kw),
                ],
                out_specs=pl.BlockSpec((tn, cp), lambda i: (i, 0)),
            ),
            compiler_params=pltpu.CompilerParams(
                dimension_semantics=("parallel",),
                vmem_limit_bytes=32 * 1024 * 1024,
            ),
        )(xb, w1p, b1p, w2p, b2p)

    try:
        # Constant-index blocks don't need double buffers (VMEM headroom on v7x).
        out_p = _call(pl.Buffered(1))
    except Exception:
        # Fallback for JAX versions without single-buffer pipeline_mode support.
        out_p = _call(None)

    # Padded batch rows / output columns are sliced off (caller could consume
    # the padded (np_, cp) layout directly to skip this copy).
    return out_p[:n, :c]


def init_params(key, input_dim, reduced_dim, num_classes):
    # Deterministic synthetic init mimicking nn.Linear's uniform(-1/sqrt(fan_in), 1/sqrt(fan_in)).
    k1, k2, k3, k4 = jax.random.split(key, 4)
    bound1 = 1.0 / jnp.sqrt(input_dim)
    bound2 = 1.0 / jnp.sqrt(reduced_dim)
    w1 = jax.random.uniform(k1, (input_dim, reduced_dim), jnp.float32, -bound1, bound1)
    b1 = jax.random.uniform(k2, (reduced_dim,), jnp.float32, -bound1, bound1)
    w2 = jax.random.uniform(k3, (reduced_dim, num_classes), jnp.float32, -bound2, bound2)
    b2 = jax.random.uniform(k4, (num_classes,), jnp.float32, -bound2, bound2)
    return w1, b1, w2, b2


if __name__ == "__main__":
    input_dim, reduced_dim, num_classes = 32, 16, 8

    key = jax.random.PRNGKey(0)
    kx, kx2, kp = jax.random.split(key, 3)
    w1, b1, w2, b2 = init_params(kp, input_dim, reduced_dim, num_classes)

    # Padding / bf16 cast done once, outside the forward pass.
    params = prepare_params(w1, b1, w2, b2)

    def ref_fn(x):  # exact f32 PyTorch semantics
        return jnp.maximum(x @ w1 + b1[None, :], 0.0) @ w2 + b2[None, :]

    # Small batch (single grid step).
    x_small = jax.random.normal(kx, (8, input_dim), jnp.float32)
    out_small = jax.block_until_ready(classification_forward(x_small, params))
    assert out_small.shape == (8, num_classes)
    # bf16 inputs/weights with f32 accumulation -> relaxed tolerance vs f32 ref.
    assert jnp.allclose(out_small, ref_fn(x_small), atol=6e-2, rtol=6e-2)

    # Larger, non-multiple batch (exercises the tail-aware tiled grid + slicing path).
    x_big = jax.random.normal(kx2, (300, input_dim), jnp.float32)
    out_big = jax.block_until_ready(classification_forward(x_big, params))
    assert out_big.shape == (300, num_classes)
    assert jnp.allclose(out_big, ref_fn(x_big), atol=6e-2, rtol=6e-2)

    print("KERNEL_OK")
</pallas_src>

<mosaic_0001>
module attributes {stable_mosaic.version = 11 : i64} {
  func.func @mlp_kernel(%arg0: i32, %arg1: memref<8x32xbf16, #tpu.memory_space<vmem>>, %arg2: memref<32x128xbf16, #tpu.memory_space<vmem>>, %arg3: memref<1x128xf32, #tpu.memory_space<vmem>>, %arg4: memref<128x128xbf16, #tpu.memory_space<vmem>>, %arg5: memref<1x128xf32, #tpu.memory_space<vmem>>, %arg6: memref<8x128xf32, #tpu.memory_space<vmem>>) attributes {dimension_semantics = [#tpu.dimension_semantics<parallel>], iteration_bounds = array<i64: 1>, scalar_prefetch = 0 : i64, scratch_operands = 0 : i64, tpu.core_type = #tpu.core_type<tc>, window_params = [{transform_indices = @transform_0, window_bounds = array<i64: 8, 32>}, {pipeline_mode = #tpu.pipeline_mode<synchronous>, transform_indices = @transform_1, window_bounds = array<i64: 32, 128>}, {pipeline_mode = #tpu.pipeline_mode<synchronous>, transform_indices = @transform_2, window_bounds = array<i64: 1, 128>}, {pipeline_mode = #tpu.pipeline_mode<synchronous>, transform_indices = @transform_3, window_bounds = array<i64: 128, 128>}, {pipeline_mode = #tpu.pipeline_mode<synchronous>, transform_indices = @transform_4, window_bounds = array<i64: 1, 128>}, {transform_indices = @transform_5, window_bounds = array<i64: 8, 128>}]} {
    %c0 = arith.constant 0 : index
    %c0_0 = arith.constant 0 : index
    %0 = vector.load %arg1[%c0, %c0_0] : memref<8x32xbf16, #tpu.memory_space<vmem>>, vector<8x32xbf16>
    %c0_1 = arith.constant 0 : index
    %c0_2 = arith.constant 0 : index
    %1 = vector.load %arg2[%c0_1, %c0_2] : memref<32x128xbf16, #tpu.memory_space<vmem>>, vector<32x128xbf16>
    %cst = arith.constant dense<0.000000e+00> : vector<8x128xf32>
    %2 = tpu.matmul %0, %1, %cst {dimension_numbers = #tpu.dot_dimension_numbers<[1], [0], [0], [1], [0, 0, 1, 1], [], []>} : vector<8x32xbf16>, vector<32x128xbf16>, vector<8x128xf32> -> vector<8x128xf32>
    %c0_3 = arith.constant 0 : index
    %c0_4 = arith.constant 0 : index
    %3 = vector.load %arg3[%c0_3, %c0_4] : memref<1x128xf32, #tpu.memory_space<vmem>>, vector<1x128xf32>
    %4 = vector.broadcast %3 : vector<1x128xf32> to vector<8x128xf32>
    %5 = arith.addf %2, %4 : vector<8x128xf32>
    %cst_5 = arith.constant 0.000000e+00 : f32
    %6 = vector.broadcast %cst_5 : f32 to vector<8x128xf32>
    %7 = arith.maximumf %5, %6 : vector<8x128xf32>
    %8 = arith.truncf %7 : vector<8x128xf32> to vector<8x128xbf16>
    %c0_6 = arith.constant 0 : index
    %c0_7 = arith.constant 0 : index
    %9 = vector.load %arg4[%c0_6, %c0_7] : memref<128x128xbf16, #tpu.memory_space<vmem>>, vector<128x128xbf16>
    %cst_8 = arith.constant dense<0.000000e+00> : vector<8x128xf32>
    %10 = tpu.matmul %8, %9, %cst_8 {dimension_numbers = #tpu.dot_dimension_numbers<[1], [0], [0], [1], [0, 0, 1, 1], [], []>} : vector<8x128xbf16>, vector<128x128xbf16>, vector<8x128xf32> -> vector<8x128xf32>
    %c0_9 = arith.constant 0 : index
    %c0_10 = arith.constant 0 : index
    %11 = vector.load %arg5[%c0_9, %c0_10] : memref<1x128xf32, #tpu.memory_space<vmem>>, vector<1x128xf32>
    %12 = vector.broadcast %11 : vector<1x128xf32> to vector<8x128xf32>
    %13 = arith.addf %10, %12 : vector<8x128xf32>
    %c0_11 = arith.constant 0 : index
    %c0_12 = arith.constant 0 : index
    %14 = vector.load %arg6[%c0_11, %c0_12] : memref<8x128xf32, #tpu.memory_space<vmem>>, vector<8x128xf32>
    tpu.vector_store %arg6[%c0_11, %c0_12], %13 {strides = array<i32>} : memref<8x128xf32, #tpu.memory_space<vmem>>, vector<8x128xf32>,
    return
  }
  func.func @transform_0(%arg0: i32) -> (i32, i32) {
    %c0_i32 = arith.constant 0 : i32
    %c0_i32_0 = arith.constant 0 : i32
    return %arg0, %c0_i32 : i32, i32
  }
  func.func @transform_1(%arg0: i32) -> (i32, i32) {
    %c0_i32 = arith.constant 0 : i32
    %c0_i32_0 = arith.constant 0 : i32
    %c0_i32_1 = arith.constant 0 : i32
    return %c0_i32, %c0_i32_0 : i32, i32
  }
  func.func @transform_2(%arg0: i32) -> (i32, i32) {
    %c0_i32 = arith.constant 0 : i32
    %c0_i32_0 = arith.constant 0 : i32
    %c0_i32_1 = arith.constant 0 : i32
    return %c0_i32, %c0_i32_0 : i32, i32
  }
  func.func @transform_3(%arg0: i32) -> (i32, i32) {
    %c0_i32 = arith.constant 0 : i32
    %c0_i32_0 = arith.constant 0 : i32
    %c0_i32_1 = arith.constant 0 : i32
    return %c0_i32, %c0_i32_0 : i32, i32
  }
  func.func @transform_4(%arg0: i32) -> (i32, i32) {
    %c0_i32 = arith.constant 0 : i32
    %c0_i32_0 = arith.constant 0 : i32
    %c0_i32_1 = arith.constant 0 : i32
    return %c0_i32, %c0_i32_0 : i32, i32
  }
  func.func @transform_5(%arg0: i32) -> (i32, i32) {
    %c0_i32 = arith.constant 0 : i32
    %c0_i32_0 = arith.constant 0 : i32
    return %arg0, %c0_i32 : i32, i32
  }
}

module attributes {stable_mosaic.version = 11 : i64} {
  func.func @mlp_kernel(%arg0: i32, %arg1: memref<8x32xbf16, #tpu.memory_space<vmem>>, %arg2: memref<32x128xbf16, #tpu.memory_space<vmem>>, %arg3: memref<1x128xf32, #tpu.memory_space<vmem>>, %arg4: memref<128x128xbf16, #tpu.memory_space<vmem>>, %arg5: memref<1x128xf32, #tpu.memory_space<vmem>>, %arg6: memref<8x128xf32, #tpu.memory_space<vmem>>) attributes {dimension_semantics = [#tpu.dimension_semantics<parallel>], iteration_bounds = array<i64: 1>, scalar_prefetch = 0 : i64, scratch_operands = 0 : i64, tpu.core_type = #tpu.core_type<tc>, window_params = [{transform_indices = @transform_0, window_bounds = array<i64: 8, 32>}, {pipeline_mode = #tpu.pipeline_mode<synchronous>, transform_indices = @transform_1, window_bounds = array<i64: 32, 128>}, {pipeline_mode = #tpu.pipeline_mode<synchronous>, transform_indices = @transform_2, window_bounds = array<i64: 1, 128>}, {pipeline_mode = #tpu.pipeline_mode<synchronous>, transform_indices = @transform_3, window_bounds = array<i64: 128, 128>}, {pipeline_mode = #tpu.pipeline_mode<synchronous>, transform_indices = @transform_4, window_bounds = array<i64: 1, 128>}, {transform_indices = @transform_5, window_bounds = array<i64: 8, 128>}]} {
    %c0 = arith.constant 0 : index
    %c0_0 = arith.constant 0 : index
    %0 = vector.load %arg1[%c0, %c0_0] : memref<8x32xbf16, #tpu.memory_space<vmem>>, vector<8x32xbf16>
    %c0_1 = arith.constant 0 : index
    %c0_2 = arith.constant 0 : index
    %1 = vector.load %arg2[%c0_1, %c0_2] : memref<32x128xbf16, #tpu.memory_space<vmem>>, vector<32x128xbf16>
    %cst = arith.constant dense<0.000000e+00> : vector<8x128xf32>
    %2 = tpu.matmul %0, %1, %cst {dimension_numbers = #tpu.dot_dimension_numbers<[1], [0], [0], [1], [0, 0, 1, 1], [], []>} : vector<8x32xbf16>, vector<32x128xbf16>, vector<8x128xf32> -> vector<8x128xf32>
    %c0_3 = arith.constant 0 : index
    %c0_4 = arith.constant 0 : index
    %3 = vector.load %arg3[%c0_3, %c0_4] : memref<1x128xf32, #tpu.memory_space<vmem>>, vector<1x128xf32>
    %4 = vector.broadcast %3 : vector<1x128xf32> to vector<8x128xf32>
    %5 = arith.addf %2, %4 : vector<8x128xf32>
    %cst_5 = arith.constant 0.000000e+00 : f32
    %6 = vector.broadcast %cst_5 : f32 to vector<8x128xf32>
    %7 = arith.maximumf %5, %6 : vector<8x128xf32>
    %8 = arith.truncf %7 : vector<8x128xf32> to vector<8x128xbf16>
    %c0_6 = arith.constant 0 : index
    %c0_7 = arith.constant 0 : index
    %9 = vector.load %arg4[%c0_6, %c0_7] : memref<128x128xbf16, #tpu.memory_space<vmem>>, vector<128x128xbf16>
    %cst_8 = arith.constant dense<0.000000e+00> : vector<8x128xf32>
    %10 = tpu.matmul %8, %9, %cst_8 {dimension_numbers = #tpu.dot_dimension_numbers<[1], [0], [0], [1], [0, 0, 1, 1], [], []>} : vector<8x128xbf16>, vector<128x128xbf16>, vector<8x128xf32> -> vector<8x128xf32>
    %c0_9 = arith.constant 0 : index
    %c0_10 = arith.constant 0 : index
    %11 = vector.load %arg5[%c0_9, %c0_10] : memref<1x128xf32, #tpu.memory_space<vmem>>, vector<1x128xf32>
    %12 = vector.broadcast %11 : vector<1x128xf32> to vector<8x128xf32>
    %13 = arith.addf %10, %12 : vector<8x128xf32>
    %c0_11 = arith.constant 0 : index
    %c0_12 = arith.constant 0 : index
    %14 = vector.load %arg6[%c0_11, %c0_12] : memref<8x128xf32, #tpu.memory_space<vmem>>, vector<8x128xf32>
    tpu.vector_store %arg6[%c0_11, %c0_12], %13 {strides = array<i32>} : memref<8x128xf32, #tpu.memory_space<vmem>>, vector<8x128xf32>,
    return
  }
  func.func @transform_0(%arg0: i32) -> (i32, i32) {
    %c0_i32 = arith.constant 0 : i32
    %c0_i32_0 = arith.constant 0 : i32
    return %arg0, %c0_i32 : i32, i32
  }
  func.func @transform_1(%arg0: i32) -> (i32, i32) {
    %c0_i32 = arith.constant 0 : i32
    %c0_i32_0 = arith.constant 0 : i32
    %c0_i32_1 = arith.constant 0 : i32
    return %c0_i32, %c0_i32_0 : i32, i32
  }
  func.func @transform_2(%arg0: i32) -> (i32, i32) {
    %c0_i32 = arith.constant 0 : i32
    %c0_i32_0 = arith.constant 0 : i32
    %c0_i32_1 = arith.constant 0 : i32
    return %c0_i32, %c0_i32_0 : i32, i32
  }
  func.func @transform_3(%arg0: i32) -> (i32, i32) {
    %c0_i32 = arith.constant 0 : i32
    %c0_i32_0 = arith.constant 0 : i32
    %c0_i32_1 = arith.constant 0 : i32
    return %c0_i32, %c0_i32_0 : i32, i32
  }
  func.func @transform_4(%arg0: i32) -> (i32, i32) {
    %c0_i32 = arith.constant 0 : i32
    %c0_i32_0 = arith.constant 0 : i32
    %c0_i32_1 = arith.constant 0 : i32
    return %c0_i32, %c0_i32_0 : i32, i32
  }
  func.func @transform_5(%arg0: i32) -> (i32, i32) {
    %c0_i32 = arith.constant 0 : i32
    %c0_i32_0 = arith.constant 0 : i32
    return %arg0, %c0_i32 : i32, i32
  }
}

</mosaic_0001>

<bundles_post_ra>
// kernel: tpu_custom_call.1
= control target key start
LH: loop header
LB: loop body
LE: loop exit
PB: predicated region body
PF: predicated region fallthrough
CT: control target
= control target key end

     0   :  { %10 = vsyncpa [#allocation3], 0  ;;  %s472_s0 = inlined_call_operand.hbm [shape: bf16[8,32], index: 0, kind: input, shape index: {}]   ;;  %s473_s1 = inlined_call_operand.hbm [shape: bf16[32,128], index: 1, kind: input, shape index: {}]   ;;  %s474_s2 = inlined_call_operand.vmem [shape: f32[1,128], index: 2, kind: input, shape index: {}]   ;;  %s475_s3 = inlined_call_operand.hbm [shape: bf16[128,128], index: 3, kind: input, shape index: {}]   ;;  %s476_s4 = inlined_call_operand.vmem [shape: f32[1,128], index: 4, kind: input, shape index: {}]   ;;  %s477_s5 = inlined_call_operand.hbm [shape: f32[8,128], index: 5, kind: output, shape index: {}]  }
   0x1   :  { %11 = vsyncpa [#allocation6], 0 }
   0x2   :  { %12 = vsyncpa [#allocation4], 0  ;;  %s416_s18 = smov [#allocation5]  }
   0x3   :  { %s28_s19 = sshll.u32 %s416_s18, 4  ;;  %s29_s19 = int_to_ptr.vmem [resolvable:$true] %s28_s19 }
   0x4   :  { %s338_s20 = scalar_lea.vmem %s29_s19, 256  ;;  %p343_p1 = scmp.lt.s32.totalorder %s29_s19, %s29_s19 }
   0x5   :  { %p339_p0 = scmp.ne.s32.totalorder %s29_s19, %s338_s20  ;;  %p344_p2 = scmp.lt.s32.totalorder %s338_s20, %s338_s20 }
   0x7   :  { %p345_p3 = por %p344_p2, %p343_p1 }
   0x9   :  { %p346_p4 = pnand %p345_p3, %p339_p0 }
   0xb   :  { %349 = shalt.err (!%p346_p4)
}
   0xc   :  { %s417_s21 = smov 64   ;;  %s418_s22 = smov 4  }
   0xd   :  { %34 = dma.hbm_to_vmem [thread:$0]  %s473_s1, 256, %s29_s19, [#allocation6], %s417_s21, %s417_s21, %s418_s22  }
   0xe   :  { %s419_s25 = smov [#allocation2]   ;;  %s420_s27 = smov [#allocation7]  }
   0xf   :  { %s19_s26 = sshll.u32 %s419_s25, 4  ;;  %s42_s28 = sshll.u32 %s420_s27, 4  ;;  %s20_s26 = int_to_ptr.vmem [resolvable:$true] %s19_s26  ;;  %s43_s28 = int_to_ptr.vmem [resolvable:$true] %s42_s28 }
  0x10   :  { %s358_s29 = scalar_lea.vmem %s20_s26, 64  ;;  %p363_p6 = scmp.lt.s32.totalorder %s20_s26, %s20_s26 }
  0x11   :  { %p359_p5 = scmp.ne.s32.totalorder %s20_s26, %s358_s29  ;;  %p364_p7 = scmp.lt.s32.totalorder %s358_s29, %s358_s29 }
  0x13   :  { %p365_p8 = por %p364_p7, %p363_p6 }
  0x15   :  { %p366_p9 = pnand %p365_p8, %p359_p5 }
  0x17   :  { %369 = shalt.err (!%p366_p9)
}
  0x18   :  { %22 = dma.hbm_to_vmem [thread:$0]  %s472_s0, 64, %s20_s26, [#allocation3]  }
  0x19   :  { %s378_s7 = scalar_lea.vmem %s43_s28, 1024  ;;  %p383_p11 = scmp.lt.s32.totalorder %s43_s28, %s43_s28 }
  0x1a   :  { %p379_p10 = scmp.ne.s32.totalorder %s43_s28, %s378_s7  ;;  %p384_p12 = scmp.lt.s32.totalorder %s378_s7, %s378_s7 }
  0x1c   :  { %p385_p13 = por %p384_p12, %p383_p11 }
  0x1e   :  { %p386_p0 = pnand %p385_p13, %p379_p10 }
  0x20   :  { %389 = shalt.err (!%p386_p0)
}
  0x21   :  { %48 = dma.hbm_to_vmem [thread:$0]  %s475_s3, 1024, %s43_s28, [#allocation6], %s417_s21, %s417_s21, %s418_s22  }
  0x22   :  { %410 = dma.done.wait [#allocation3], 64  }
  0x23   :  { %411 = vsyncadd [#allocation3], 4294967232 }
  0x24   :  { %412 = dma.done.wait [#allocation6], 1280  }
  0x25   :  { %413 = vsyncadd [#allocation6], 4294966016  ;;  %v421_v0 = vmov 0.0   ;;  %vm422_vm0 = vmmov 0   ;;  %v320_v1 = vld [vmem:[#allocation5 + $0x8] sm:$0xff]   ;;  %v321_v2 = vld [vmem:[#allocation5] sm:$0xff]  }
  0x26   :  { %284 = vmatprep.subr.bf16.mxu0 %v421_v0  ;;  %288 = vmatprep.mubr.msk.bf16.mxu0 %vm422_vm0, %v421_v0  ;;  %v322_v3 = vld [vmem:[#allocation7 + $0x38] sm:$0xff]   ;;  %vm85_vm1 = vcmask 261120   ;;  %v323_v4 = vld [vmem:[#allocation7 + $0x30] sm:$0xff]   ;;  %v61_v5 = vld [vmem:[#allocation2] sm:$0xf]  ;;  %s423_s11 = smov [#allocation8]  }
  0x27   :  { %292 = vmatprep.subr.bf16.mxu1 %v421_v0  ;;  %308 = vmatprep.mubr.msk.bf16.mxu1 %vm422_vm0, %v421_v0  ;;  %v324_v6 = vld [vmem:[#allocation7 + $0x28] sm:$0xff]   ;;  %v325_v7 = vld [vmem:[#allocation7 + $0x20] sm:$0xff]   ;;  %v326_v8 = vld [vmem:[#allocation7 + $0x18] sm:$0xff]   ;;  %s249_s12 = sshll.u32 %s423_s11, 4  ;;  %s250_s12 = int_to_ptr.vmem [resolvable:$true] %s249_s12 }
  0x28   :  { %285 = vmatpush3.bf16.msra.mxu0 %v320_v1  ;;  %293 = vmatpush3.bf16.msra.mxu1 %v322_v3  ;;  %v327_v9 = vld [vmem:[#allocation7 + $0x10] sm:$0xff]   ;;  %v328_v10 = vld [vmem:[#allocation7 + $0x8] sm:$0xff]   ;;  %v329_v11 = vld [vmem:[#allocation7] sm:$0xff]   ;;  %p395_p2 = scmp.lt.s32.totalorder %s250_s12, %s250_s12 }
  0x29   :  { %286 = vmatprep.subr.bf16.mxu0 %v421_v0  ;;  %294 = vmatprep.subr.bf16.mxu1 %v421_v0  ;;  %v259_v12 = vld [vmem:[%s474_s2] ss:$0 sm:$0xff]  ;;  %s390_s2 = scalar_lea.vmem %s250_s12, 128 }
  0x2a   :  { %v263_v20 = vld [vmem:[%s476_s4] ss:$0 sm:$0xff]  ;;  %p391_p1 = scmp.ne.s32.totalorder %s250_s12, %s390_s2  ;;  %p396_p3 = scmp.lt.s32.totalorder %s390_s2, %s390_s2 }
  0x2c   :  { %287 = vmatpush3.bf16.msra.mxu0 %v321_v2  ;;  %295 = vmatpush3.bf16.msra.mxu1 %v323_v4  ;;  %p397_p4 = por %p396_p3, %p395_p2 }
  0x2d   :  { %296 = vmatprep.subr.bf16.mxu1 %v421_v0 }
  0x2e   :  { %p398_p5 = pnand %p397_p4, %p391_p1 }
  0x2f   :  { %289 = vmatmul.mubr.msk.bf16.vlgmr.msra.gmra.mxu0 %vm85_vm1, %v61_v5 }
  0x30   :  { %297 = vmatpush3.bf16.msra.mxu1 %v324_v6 }
  0x31   :  { %298 = vmatprep.subr.bf16.mxu1 %v421_v0 }
  0x34   :  { %299 = vmatpush3.bf16.msra.mxu1 %v325_v7 }
  0x35   :  { %300 = vmatprep.subr.bf16.mxu1 %v421_v0 }
  0x38   :  { %301 = vmatpush3.bf16.msra.mxu1 %v326_v8 }
  0x39   :  { %302 = vmatprep.subr.bf16.mxu1 %v421_v0 }
  0x3c   :  { %303 = vmatpush3.bf16.msra.mxu1 %v327_v9 }
  0x3d   :  { %304 = vmatprep.subr.bf16.mxu1 %v421_v0 }
  0x40   :  { %305 = vmatpush3.bf16.msra.mxu1 %v328_v10 }
  0x41   :  { %306 = vmatprep.subr.bf16.mxu1 %v421_v0 }
  0x44   :  { %307 = vmatpush3.bf16.msra.mxu1 %v329_v11 }
  0xef   :  { %v123_v13 = vpop.f32.mrf.mxu0 }
  0xf0   :  { %v124_v14 = vadd.f32 %v259_v12, %v123_v13 }
  0xf1   :  { %v290_v15 = vpop.f32.mrf.mxu0 }
  0xf2   :  { %v129_v16 = vmax.f32 %v124_v14, 0.0 }
  0xf3   :  { %v126_v17 = vpop.f32.mrf.mxu0 }
  0xf4   :  { %v130_v18 = vpack.c.bf16 %v129_v16, %v129_v16 }
  0xf5   :  { %v291_v19 = vpop.f32.mrf.mxu0 }
  0xf6   :  { %309 = vmatmul.mubr.bf16.vlgmr.msra.gmra.mxu1 %v130_v18 }
 0x1b6   :  { %v236_v21 = vpop.f32.mrf.mxu1 }
 0x1b7   :  { %v237_v22 = vadd.f32 %v263_v20, %v236_v21 }
 0x1b8   :  { %v310_v23 = vpop.f32.mrf.mxu1 }
 0x1b9   :  { %242 = vst [vmem:[#allocation8] sm:$0xff] %v237_v22 }
 0x1ba   :  { %v239_v24 = vpop.f32.mrf.mxu1 }
 0x1bb   :  { %401 = shalt.err (!%p398_p5)
}
 0x1bc   :  { %252 = dma.vmem_to_hbm [thread:$0]  %s250_s12, 128, %s477_s5, [#allocation4]   ;;  %v311_v25 = vpop.f32.mrf.mxu1 }
 0x1bd   :  { %414 = dma.done.wait [#allocation4], 128  }
 0x1be   :  { %415 = vsyncadd [#allocation4], 4294967168 }
 0x1bf   :  { %256 = vsyncpa [#allocation3], 1 }
 0x1c0   :  { %257 = vsyncpa [#allocation6], 1 }
 0x1c1   :  { %258 = vsyncpa [#allocation4], 1 }

// kernel: tpu_custom_call.1
= control target key start
LH: loop header
LB: loop body
LE: loop exit
PB: predicated region body
PF: predicated region fallthrough
CT: control target
= control target key end

     0   :  { %10 = vsyncpa [#allocation3], 0  ;;  %s472_s0 = inlined_call_operand.hbm [shape: bf16[8,32], index: 0, kind: input, shape index: {}]   ;;  %s473_s1 = inlined_call_operand.hbm [shape: bf16[32,128], index: 1, kind: input, shape index: {}]   ;;  %s474_s2 = inlined_call_operand.vmem [shape: f32[1,128], index: 2, kind: input, shape index: {}]   ;;  %s475_s3 = inlined_call_operand.hbm [shape: bf16[128,128], index: 3, kind: input, shape index: {}]   ;;  %s476_s4 = inlined_call_operand.vmem [shape: f32[1,128], index: 4, kind: input, shape index: {}]   ;;  %s477_s5 = inlined_call_operand.hbm [shape: f32[8,128], index: 5, kind: output, shape index: {}]  }
   0x1   :  { %11 = vsyncpa [#allocation6], 0 }
   0x2   :  { %12 = vsyncpa [#allocation4], 0  ;;  %s416_s18 = smov [#allocation5]  }
   0x3   :  { %s28_s19 = sshll.u32 %s416_s18, 4  ;;  %s29_s19 = int_to_ptr.vmem [resolvable:$true] %s28_s19 }
   0x4   :  { %s338_s20 = scalar_lea.vmem %s29_s19, 256  ;;  %p343_p1 = scmp.lt.s32.totalorder %s29_s19, %s29_s19 }
   0x5   :  { %p339_p0 = scmp.ne.s32.totalorder %s29_s19, %s338_s20  ;;  %p344_p2 = scmp.lt.s32.totalorder %s338_s20, %s338_s20 }
   0x7   :  { %p345_p3 = por %p344_p2, %p343_p1 }
   0x9   :  { %p346_p4 = pnand %p345_p3, %p339_p0 }
   0xb   :  { %349 = shalt.err (!%p346_p4)
}
   0xc   :  { %s417_s21 = smov 64   ;;  %s418_s22 = smov 4  }
   0xd   :  { %34 = dma.hbm_to_vmem [thread:$0]  %s473_s1, 256, %s29_s19, [#allocation6], %s417_s21, %s417_s21, %s418_s22  }
   0xe   :  { %s419_s25 = smov [#allocation2]   ;;  %s420_s27 = smov [#allocation7]  }
   0xf   :  { %s19_s26 = sshll.u32 %s419_s25, 4  ;;  %s42_s28 = sshll.u32 %s420_s27, 4  ;;  %s20_s26 = int_to_ptr.vmem [resolvable:$true] %s19_s26  ;;  %s43_s28 = int_to_ptr.vmem [resolvable:$true] %s42_s28 }
  0x10   :  { %s358_s29 = scalar_lea.vmem %s20_s26, 64  ;;  %p363_p6 = scmp.lt.s32.totalorder %s20_s26, %s20_s26 }
  0x11   :  { %p359_p5 = scmp.ne.s32.totalorder %s20_s26, %s358_s29  ;;  %p364_p7 = scmp.lt.s32.totalorder %s358_s29, %s358_s29 }
  0x13   :  { %p365_p8 = por %p364_p7, %p363_p6 }
  0x15   :  { %p366_p9 = pnand %p365_p8, %p359_p5 }
  0x17   :  { %369 = shalt.err (!%p366_p9)
}
  0x18   :  { %22 = dma.hbm_to_vmem [thread:$0]  %s472_s0, 64, %s20_s26, [#allocation3]  }
  0x19   :  { %s378_s7 = scalar_lea.vmem %s43_s28, 1024  ;;  %p383_p11 = scmp.lt.s32.totalorder %s43_s28, %s43_s28 }
  0x1a   :  { %p379_p10 = scmp.ne.s32.totalorder %s43_s28, %s378_s7  ;;  %p384_p12 = scmp.lt.s32.totalorder %s378_s7, %s378_s7 }
  0x1c   :  { %p385_p13 = por %p384_p12, %p383_p11 }
  0x1e   :  { %p386_p0 = pnand %p385_p13, %p379_p10 }
  0x20   :  { %389 = shalt.err (!%p386_p0)
}
  0x21   :  { %48 = dma.hbm_to_vmem [thread:$0]  %s475_s3, 1024, %s43_s28, [#allocation6], %s417_s21, %s417_s21, %s418_s22  }
  0x22   :  { %410 = dma.done.wait [#allocation3], 64  }
  0x23   :  { %411 = vsyncadd [#allocation3], 4294967232 }
  0x24   :  { %412 = dma.done.wait [#allocation6], 1280  }
  0x25   :  { %413 = vsyncadd [#allocation6], 4294966016  ;;  %v421_v0 = vmov 0.0   ;;  %vm422_vm0 = vmmov 0   ;;  %v320_v1 = vld [vmem:[#allocation5 + $0x8] sm:$0xff]   ;;  %v321_v2 = vld [vmem:[#allocation5] sm:$0xff]  }
  0x26   :  { %284 = vmatprep.subr.bf16.mxu0 %v421_v0  ;;  %288 = vmatprep.mubr.msk.bf16.mxu0 %vm422_vm0, %v421_v0  ;;  %v322_v3 = vld [vmem:[#allocation7 + $0x38] sm:$0xff]   ;;  %vm85_vm1 = vcmask 261120   ;;  %v323_v4 = vld [vmem:[#allocation7 + $0x30] sm:$0xff]   ;;  %v61_v5 = vld [vmem:[#allocation2] sm:$0xf]  ;;  %s423_s11 = smov [#allocation8]  }
  0x27   :  { %292 = vmatprep.subr.bf16.mxu1 %v421_v0  ;;  %308 = vmatprep.mubr.msk.bf16.mxu1 %vm422_vm0, %v421_v0  ;;  %v324_v6 = vld [vmem:[#allocation7 + $0x28] sm:$0xff]   ;;  %v325_v7 = vld [vmem:[#allocation7 + $0x20] sm:$0xff]   ;;  %v326_v8 = vld [vmem:[#allocation7 + $0x18] sm:$0xff]   ;;  %s249_s12 = sshll.u32 %s423_s11, 4  ;;  %s250_s12 = int_to_ptr.vmem [resolvable:$true] %s249_s12 }
  0x28   :  { %285 = vmatpush3.bf16.msra.mxu0 %v320_v1  ;;  %293 = vmatpush3.bf16.msra.mxu1 %v322_v3  ;;  %v327_v9 = vld [vmem:[#allocation7 + $0x10] sm:$0xff]   ;;  %v328_v10 = vld [vmem:[#allocation7 + $0x8] sm:$0xff]   ;;  %v329_v11 = vld [vmem:[#allocation7] sm:$0xff]   ;;  %p395_p2 = scmp.lt.s32.totalorder %s250_s12, %s250_s12 }
  0x29   :  { %286 = vmatprep.subr.bf16.mxu0 %v421_v0  ;;  %294 = vmatprep.subr.bf16.mxu1 %v421_v0  ;;  %v259_v12 = vld [vmem:[%s474_s2] ss:$0 sm:$0xff]  ;;  %s390_s2 = scalar_lea.vmem %s250_s12, 128 }
  0x2a   :  { %v263_v20 = vld [vmem:[%s476_s4] ss:$0 sm:$0xff]  ;;  %p391_p1 = scmp.ne.s32.totalorder %s250_s12, %s390_s2  ;;  %p396_p3 = scmp.lt.s32.totalorder %s390_s2, %s390_s2 }
  0x2c   :  { %287 = vmatpush3.bf16.msra.mxu0 %v321_v2  ;;  %295 = vmatpush3.bf16.msra.mxu1 %v323_v4  ;;  %p397_p4 = por %p396_p3, %p395_p2 }
  0x2d   :  { %296 = vmatprep.subr.bf16.mxu1 %v421_v0 }
  0x2e   :  { %p398_p5 = pnand %p397_p4, %p391_p1 }
  0x2f   :  { %289 = vmatmul.mubr.msk.bf16.vlgmr.msra.gmra.mxu0 %vm85_vm1, %v61_v5 }
  0x30   :  { %297 = vmatpush3.bf16.msra.mxu1 %v324_v6 }
  0x31   :  { %298 = vmatprep.subr.bf16.mxu1 %v421_v0 }
  0x34   :  { %299 = vmatpush3.bf16.msra.mxu1 %v325_v7 }
  0x35   :  { %300 = vmatprep.subr.bf16.mxu1 %v421_v0 }
  0x38   :  { %301 = vmatpush3.bf16.msra.mxu1 %v326_v8 }
  0x39   :  { %302 = vmatprep.subr.bf16.mxu1 %v421_v0 }
  0x3c   :  { %303 = vmatpush3.bf16.msra.mxu1 %v327_v9 }
  0x3d   :  { %304 = vmatprep.subr.bf16.mxu1 %v421_v0 }
  0x40   :  { %305 = vmatpush3.bf16.msra.mxu1 %v328_v10 }
  0x41   :  { %306 = vmatprep.subr.bf16.mxu1 %v421_v0 }
  0x44   :  { %307 = vmatpush3.bf16.msra.mxu1 %v329_v11 }
  0xef   :  { %v123_v13 = vpop.f32.mrf.mxu0 }
  0xf0   :  { %v124_v14 = vadd.f32 %v259_v12, %v123_v13 }
  0xf1   :  { %v290_v15 = vpop.f32.mrf.mxu0 }
  0xf2   :  { %v129_v16 = vmax.f32 %v124_v14, 0.0 }
  0xf3   :  { %v126_v17 = vpop.f32.mrf.mxu0 }
  0xf4   :  { %v130_v18 = vpack.c.bf16 %v129_v16, %v129_v16 }
  0xf5   :  { %v291_v19 = vpop.f32.mrf.mxu0 }
  0xf6   :  { %309 = vmatmul.mubr.bf16.vlgmr.msra.gmra.mxu1 %v130_v18 }
 0x1b6   :  { %v236_v21 = vpop.f32.mrf.mxu1 }
 0x1b7   :  { %v237_v22 = vadd.f32 %v263_v20, %v236_v21 }
 0x1b8   :  { %v310_v23 = vpop.f32.mrf.mxu1 }
 0x1b9   :  { %242 = vst [vmem:[#allocation8] sm:$0xff] %v237_v22 }
 0x1ba   :  { %v239_v24 = vpop.f32.mrf.mxu1 }
 0x1bb   :  { %401 = shalt.err (!%p398_p5)
}
 0x1bc   :  { %252 = dma.vmem_to_hbm [thread:$0]  %s250_s12, 128, %s477_s5, [#allocation4]   ;;  %v311_v25 = vpop.f32.mrf.mxu1 }
 0x1bd   :  { %414 = dma.done.wait [#allocation4], 128  }
 0x1be   :  { %415 = vsyncadd [#allocation4], 4294967168 }
 0x1bf   :  { %256 = vsyncpa [#allocation3], 1 }
 0x1c0   :  { %257 = vsyncpa [#allocation6], 1 }
 0x1c1   :  { %258 = vsyncpa [#allocation4], 1 }

</bundles_post_ra>
